<compile_context>
chip_gen: v6e
topology: v6e:2x2x1
jax: 0.10.0
libtpu: 0.0.40
codegen_flags: <defaults>
</compile_context>

<pallas_src>
import math

import jax
import jax.numpy as jnp
from jax.experimental import pallas as pl
from jax.experimental.pallas import tpu as pltpu

# ---- synthetic small hyper-parameters (consistent with the module) ----------
NUM_LEADS = 12          # ECG has 12 leads; forward selects [0, 6, 7, 8]
LEAD_IDX = (0, 6, 7, 8)
T = 64                  # time samples per lead
FRAME = 8               # framing of the 1-D signal into tokens
SEQ = T // FRAME        # 8 tokens ("sequence" of last_hidden_state)
HIDDEN = 32             # base_model.config.hidden_size
C = SEQ * HIDDEN        # 256 concatenated hidden lanes (lane-dense activations)
NUM_CLASSES = 5         # num_classes for the Linear head
OUT_PAD = 8             # classifier logits padded to 8 lanes (full-dim block)


def _round_up(n, m):
    return ((n + m - 1) // m) * m


def ecg_kernel(x_ref, w_in_ref, b_in_ref, w_big_ref, segsum_ref, expand_ref,
               stack_ref, wo_ref, wc_ref, bc_ref, o_ref):
    # ---- feature projection, all SEQ tokens at once --------------------------
    # x_ref: [TB, T]; w_in_bd: [T, C] block-diagonal -> h: [TB, C] lane-dense,
    # where h[:, s*H:(s+1)*H] is the hidden state of token s.
    h = jnp.dot(x_ref[...], w_in_ref[...], preferred_element_type=jnp.float32)
    h = jax.nn.gelu(h + b_in_ref[...], approximate=True)            # [TB, C]

    # ---- fused projection: [K_blockdiag | V_blockdiag | Q_cls replicated] ----
    proj = jnp.dot(h, w_big_ref[...],
                   preferred_element_type=jnp.float32)              # [TB, 3C]
    k = proj[:, 0 * C:1 * C]          # [TB, C]   (slices at 256-lane boundaries)
    v = proj[:, 1 * C:2 * C]          # [TB, C]
    q = proj[:, 2 * C:3 * C]          # CLS query per token, pre-scaled 1/sqrt(H)

    # ---- CLS-token-only single-head attention --------------------------------
    # scores[:, s] = <q_cls, k_s> / sqrt(H): segmented lane reduction via MXU.
    scores = jnp.dot(q * k, segsum_ref[...],
                     preferred_element_type=jnp.float32)            # [TB, SEQ]
    scores = scores - jnp.max(scores, axis=-1, keepdims=True)
    p = jnp.exp(scores)
    attn = p / jnp.sum(p, axis=-1, keepdims=True)                   # [TB, SEQ]
    # broadcast attention weights over each token's H lanes, weight V, reduce.
    attn_rep = jnp.dot(attn, expand_ref[...],
                       preferred_element_type=jnp.float32)          # [TB, C]
    ctx = jnp.dot(attn_rep * v, stack_ref[...],
                  preferred_element_type=jnp.float32)               # [TB, H]

    # ---- residual + output projection + classifier head ----------------------
    h_cls = h[:, :HIDDEN]                                           # token 0
    out0 = h_cls + jnp.dot(ctx, wo_ref[...],
                           preferred_element_type=jnp.float32)      # [TB, H]
    logits = jnp.dot(out0, wc_ref[...],
                     preferred_element_type=jnp.float32) + bc_ref[...]
    o_ref[...] = logits.astype(o_ref.dtype)                         # [TB, OUT_PAD]


def pack_params(params):
    """One-time packing of module weights for the kernel (hoisted out of forward)."""
    w_in, b_in, wq, wk, wv, wo, wc, bc = params
    eye_s = jnp.eye(SEQ, dtype=jnp.float32)

    # block-diagonal input projection: frame s -> hidden segment s
    w_in_bd = jnp.kron(eye_s, w_in)                                  # [T, C]
    b_bd = jnp.tile(b_in, (1, SEQ))                                  # [1, C]

    # fused [K | V | Q_cls-replicated] projection (Q scaled by 1/sqrt(H))
    w_k_bd = jnp.kron(eye_s, wk)                                     # [C, C]
    w_v_bd = jnp.kron(eye_s, wv)                                     # [C, C]
    w_q_rep = jnp.concatenate(
        [jnp.tile(wq * (1.0 / math.sqrt(HIDDEN)), (1, SEQ)),
         jnp.zeros((C - HIDDEN, C), jnp.float32)], axis=0)           # [C, C]
    w_big = jnp.concatenate([w_k_bd, w_v_bd, w_q_rep], axis=1)       # [C, 3C]

    # constant 0/1 matrices for segmented reductions on the MXU
    seg_sum = jnp.kron(eye_s, jnp.ones((HIDDEN, 1), jnp.float32))    # [C, SEQ]
    expand = jnp.kron(eye_s, jnp.ones((1, HIDDEN), jnp.float32))     # [SEQ, C]
    stack = jnp.tile(jnp.eye(HIDDEN, dtype=jnp.float32), (SEQ, 1))   # [C, H]

    wc_pad = jnp.pad(wc, ((0, 0), (0, OUT_PAD - NUM_CLASSES)))       # [H, OUT_PAD]
    bc_pad = jnp.pad(bc, ((0, 0), (0, OUT_PAD - NUM_CLASSES)))       # [1, OUT_PAD]
    return (w_in_bd, b_bd, w_big, seg_sum, expand, stack, wo, wc_pad, bc_pad)


def ecg_classifier_forward(x, packed, tile_b=512):
    """x: [B, NUM_LEADS, T] float32 -> logits [B, NUM_CLASSES]."""
    w_in_bd, b_bd, w_big, seg_sum, expand, stack, wo, wc_pad, bc_pad = packed
    B = x.shape[0]

    # Lead selection + mean in the wrapper (pure data-volume reduction).
    sig = x[:, jnp.array(LEAD_IDX), :].mean(axis=1)                  # [B, T]

    # Pad only to the 8-row sublane multiple (at most 7 rows); ragged last
    # batch tiles are handled by the pl.cdiv grid instead of a full pad copy.
    b8 = _round_up(B, 8)
    if b8 != B:
        sig = jnp.pad(sig, ((0, b8 - B), (0, 0)))
    tile_b = min(_round_up(max(tile_b, 8), 8), b8)
    grid = (pl.cdiv(b8, tile_b),)

    weight_bytes = 4 * sum(int(w.size) for w in packed)
    cost = pl.CostEstimate(
        flops=int(2 * b8 * (T * C + C * 3 * C + 2 * C * SEQ + C * HIDDEN
                            + HIDDEN * HIDDEN + HIDDEN * OUT_PAD)),
        transcendentals=int(b8 * (C + SEQ)),
        bytes_accessed=int(4 * b8 * (T + OUT_PAD) + weight_bytes),
    )

    grid_spec = pltpu.PrefetchScalarGridSpec(
        num_scalar_prefetch=0,
        grid=grid,
        in_specs=[
            pl.BlockSpec((tile_b, T), lambda i: (i, 0)),          # signal tile
            pl.BlockSpec((T, C), lambda i: (0, 0)),               # w_in_bd
            pl.BlockSpec((1, C), lambda i: (0, 0)),               # b_bd
            pl.BlockSpec((C, 3 * C), lambda i: (0, 0)),           # w_big
            pl.BlockSpec((C, SEQ), lambda i: (0, 0)),             # seg_sum
            pl.BlockSpec((SEQ, C), lambda i: (0, 0)),             # expand
            pl.BlockSpec((C, HIDDEN), lambda i: (0, 0)),          # stack
            pl.BlockSpec((HIDDEN, HIDDEN), lambda i: (0, 0)),     # wo
            pl.BlockSpec((HIDDEN, OUT_PAD), lambda i: (0, 0)),    # wc_pad
            pl.BlockSpec((1, OUT_PAD), lambda i: (0, 0)),         # bc_pad
        ],
        out_specs=pl.BlockSpec((tile_b, OUT_PAD), lambda i: (i, 0)),
    )

    out = pl.pallas_call(
        ecg_kernel,
        out_shape=jax.ShapeDtypeStruct((b8, OUT_PAD), jnp.float32),
        grid_spec=grid_spec,
        compiler_params=pltpu.CompilerParams(
            dimension_semantics=("parallel",),   # batch tiles shard on v7x's 2 TCs
            vmem_limit_bytes=32 * 1024 * 1024),  # above v5e's 16 MiB scoped default
        cost_estimate=cost,
    )(sig, w_in_bd, b_bd, w_big, seg_sum, expand, stack, wo, wc_pad, bc_pad)

    return out[:B, :NUM_CLASSES]


def ecg_classifier_reference(x, params):
    """Pure-JAX reference of the same forward (for correctness check)."""
    w_in, b_in, wq, wk, wv, wo, wc, bc = params
    sig = x[:, jnp.array(LEAD_IDX), :].mean(axis=1)                  # [B, T]
    frames = sig.reshape(sig.shape[0], SEQ, FRAME)                   # [B, SEQ, FRAME]
    h = jax.nn.gelu(frames @ w_in + b_in, approximate=True)          # [B, SEQ, H]
    q, k, v = h @ wq, h @ wk, h @ wv
    scores = jnp.einsum("bqh,bkh->bqk", q, k) / math.sqrt(HIDDEN)
    attn = jax.nn.softmax(scores, axis=-1)
    last_hidden = h + jnp.einsum("bqk,bkh->bqh", attn, v) @ wo
    cls = last_hidden[:, 0, :]
    return cls @ wc + bc


def init_params(key):
    ks = jax.random.split(key, 8)
    scale = 0.05
    w_in = scale * jax.random.normal(ks[0], (FRAME, HIDDEN), jnp.float32)
    b_in = scale * jax.random.normal(ks[1], (1, HIDDEN), jnp.float32)
    wq = scale * jax.random.normal(ks[2], (HIDDEN, HIDDEN), jnp.float32)
    wk = scale * jax.random.normal(ks[3], (HIDDEN, HIDDEN), jnp.float32)
    wv = scale * jax.random.normal(ks[4], (HIDDEN, HIDDEN), jnp.float32)
    wo = scale * jax.random.normal(ks[5], (HIDDEN, HIDDEN), jnp.float32)
    wc = scale * jax.random.normal(ks[6], (HIDDEN, NUM_CLASSES), jnp.float32)
    bc = scale * jax.random.normal(ks[7], (1, NUM_CLASSES), jnp.float32)
    return (w_in, b_in, wq, wk, wv, wo, wc, bc)


if __name__ == "__main__":
    key = jax.random.PRNGKey(0)
    k_x, k_p, k_x2, k_x3 = jax.random.split(key, 4)
    params = init_params(k_p)
    packed = pack_params(params)          # one-time weight packing (hoisted)

    # Tolerance sized for TPU default matmul precision (bf16 passes for f32
    # dots may differ between the XLA reference and the Mosaic kernel).
    RTOL, ATOL = 1e-2, 1e-3

    # Small example consistent with the module (single sublane-aligned tile).
    B = 2
    x = jax.random.normal(k_x, (B, NUM_LEADS, T), jnp.float32)
    logits = jax.block_until_ready(ecg_classifier_forward(x, packed))
    ref = ecg_classifier_reference(x, params)
    assert logits.shape == (B, NUM_CLASSES)
    assert jnp.allclose(logits, ref, rtol=RTOL, atol=ATOL), (logits, ref)

    # Batch not a multiple of 8: exercises the small sublane tail pad.
    B2 = 300
    x2 = jax.random.normal(k_x2, (B2, NUM_LEADS, T), jnp.float32)
    logits2 = jax.block_until_ready(ecg_classifier_forward(x2, packed))
    ref2 = ecg_classifier_reference(x2, params)
    assert logits2.shape == (B2, NUM_CLASSES)
    assert jnp.allclose(logits2, ref2, rtol=RTOL, atol=ATOL)

    # Two 512-sample batch tiles: exercises the multi-step "parallel" grid.
    B3 = 1024
    x3 = jax.random.normal(k_x3, (B3, NUM_LEADS, T), jnp.float32)
    logits3 = jax.block_until_ready(ecg_classifier_forward(x3, packed))
    ref3 = ecg_classifier_reference(x3, params)
    assert logits3.shape == (B3, NUM_CLASSES)
    assert jnp.allclose(logits3, ref3, rtol=RTOL, atol=ATOL)

    print("KERNEL_OK")
</pallas_src>

<mosaic_0001>
module attributes {stable_mosaic.version = 11 : i64} {
  func.func @ecg_kernel(%arg0: i32, %arg1: memref<8x64xf32, #tpu.memory_space<vmem>>, %arg2: memref<64x256xf32, #tpu.memory_space<vmem>>, %arg3: memref<1x256xf32, #tpu.memory_space<vmem>>, %arg4: memref<256x768xf32, #tpu.memory_space<vmem>>, %arg5: memref<256x8xf32, #tpu.memory_space<vmem>>, %arg6: memref<8x256xf32, #tpu.memory_space<vmem>>, %arg7: memref<256x32xf32, #tpu.memory_space<vmem>>, %arg8: memref<32x32xf32, #tpu.memory_space<vmem>>, %arg9: memref<32x8xf32, #tpu.memory_space<vmem>>, %arg10: memref<1x8xf32, #tpu.memory_space<vmem>>, %arg11: memref<8x8xf32, #tpu.memory_space<vmem>>) attributes {dimension_semantics = [#tpu.dimension_semantics<parallel>], iteration_bounds = array<i64: 1>, scalar_prefetch = 0 : i64, scratch_operands = 0 : i64, tpu.core_type = #tpu.core_type<tc>, window_params = [{transform_indices = @transform_0, window_bounds = array<i64: 8, 64>}, {pipeline_mode = #tpu.pipeline_mode<synchronous>, transform_indices = @transform_1, window_bounds = array<i64: 64, 256>}, {pipeline_mode = #tpu.pipeline_mode<synchronous>, transform_indices = @transform_2, window_bounds = array<i64: 1, 256>}, {pipeline_mode = #tpu.pipeline_mode<synchronous>, transform_indices = @transform_3, window_bounds = array<i64: 256, 768>}, {pipeline_mode = #tpu.pipeline_mode<synchronous>, transform_indices = @transform_4, window_bounds = array<i64: 256, 8>}, {pipeline_mode = #tpu.pipeline_mode<synchronous>, transform_indices = @transform_5, window_bounds = array<i64: 8, 256>}, {pipeline_mode = #tpu.pipeline_mode<synchronous>, transform_indices = @transform_6, window_bounds = array<i64: 256, 32>}, {pipeline_mode = #tpu.pipeline_mode<synchronous>, transform_indices = @transform_7, window_bounds = array<i64: 32, 32>}, {pipeline_mode = #tpu.pipeline_mode<synchronous>, transform_indices = @transform_8, window_bounds = array<i64: 32, 8>}, {pipeline_mode = #tpu.pipeline_mode<synchronous>, transform_indices = @transform_9, window_bounds = array<i64: 1, 8>}, {transform_indices = @transform_10, window_bounds = array<i64: 8, 8>}]} {
    %c0 = arith.constant 0 : index
    %c0_0 = arith.constant 0 : index
    %0 = vector.load %arg1[%c0, %c0_0] : memref<8x64xf32, #tpu.memory_space<vmem>>, vector<8x64xf32>
    %c0_1 = arith.constant 0 : index
    %c0_2 = arith.constant 0 : index
    %1 = vector.load %arg2[%c0_1, %c0_2] : memref<64x256xf32, #tpu.memory_space<vmem>>, vector<64x256xf32>
    %cst = arith.constant dense<0.000000e+00> : vector<8x256xf32>
    %2 = tpu.matmul %0, %1, %cst {dimension_numbers = #tpu.dot_dimension_numbers<[1], [0], [0], [1], [0, 0, 1, 1], [], []>} : vector<8x64xf32>, vector<64x256xf32>, vector<8x256xf32> -> vector<8x256xf32>
    %c0_3 = arith.constant 0 : index
    %c0_4 = arith.constant 0 : index
    %3 = vector.load %arg3[%c0_3, %c0_4] : memref<1x256xf32, #tpu.memory_space<vmem>>, vector<1x256xf32>
    %4 = vector.broadcast %3 : vector<1x256xf32> to vector<8x256xf32>
    %5 = arith.addf %2, %4 : vector<8x256xf32>
    %6 = arith.mulf %5, %5 : vector<8x256xf32>
    %7 = arith.mulf %5, %6 : vector<8x256xf32>
    %cst_5 = arith.constant 4.471500e-02 : f32
    %8 = vector.broadcast %cst_5 : f32 to vector<8x256xf32>
    %9 = arith.mulf %8, %7 : vector<8x256xf32>
    %10 = arith.addf %5, %9 : vector<8x256xf32>
    %cst_6 = arith.constant 0.797884583 : f32
    %11 = vector.broadcast %cst_6 : f32 to vector<8x256xf32>
    %12 = arith.mulf %11, %10 : vector<8x256xf32>
    %13 = math.tanh %12 : vector<8x256xf32>
    %cst_7 = arith.constant 1.000000e+00 : f32
    %14 = vector.broadcast %cst_7 : f32 to vector<8x256xf32>
    %15 = arith.addf %14, %13 : vector<8x256xf32>
    %cst_8 = arith.constant 5.000000e-01 : f32
    %16 = vector.broadcast %cst_8 : f32 to vector<8x256xf32>
    %17 = arith.mulf %16, %15 : vector<8x256xf32>
    %18 = arith.mulf %5, %17 : vector<8x256xf32>
    %c0_9 = arith.constant 0 : index
    %c0_10 = arith.constant 0 : index
    %19 = vector.load %arg4[%c0_9, %c0_10] : memref<256x768xf32, #tpu.memory_space<vmem>>, vector<256x768xf32>
    %cst_11 = arith.constant dense<0.000000e+00> : vector<8x768xf32>
    %20 = tpu.matmul %18, %19, %cst_11 {dimension_numbers = #tpu.dot_dimension_numbers<[1], [0], [0], [1], [0, 0, 1, 1], [], []>} : vector<8x256xf32>, vector<256x768xf32>, vector<8x768xf32> -> vector<8x768xf32>
    %21 = vector.extract_strided_slice %20 {offsets = [0, 0], sizes = [8, 256], strides = [1, 1]} : vector<8x768xf32> to vector<8x256xf32>
    %22 = vector.extract_strided_slice %20 {offsets = [0, 256], sizes = [8, 256], strides = [1, 1]} : vector<8x768xf32> to vector<8x256xf32>
    %23 = vector.extract_strided_slice %20 {offsets = [0, 512], sizes = [8, 256], strides = [1, 1]} : vector<8x768xf32> to vector<8x256xf32>
    %24 = arith.mulf %23, %21 : vector<8x256xf32>
    %c0_12 = arith.constant 0 : index
    %c0_13 = arith.constant 0 : index
    %25 = vector.load %arg5[%c0_12, %c0_13] : memref<256x8xf32, #tpu.memory_space<vmem>>, vector<256x8xf32>
    %cst_14 = arith.constant dense<0.000000e+00> : vector<8x8xf32>
    %26 = tpu.matmul %24, %25, %cst_14 {dimension_numbers = #tpu.dot_dimension_numbers<[1], [0], [0], [1], [0, 0, 1, 1], [], []>} : vector<8x256xf32>, vector<256x8xf32>, vector<8x8xf32> -> vector<8x8xf32>
    %cst_15 = arith.constant dense<0xFF800000> : vector<8xf32>
    %27 = vector.multi_reduction <maximumf>, %26, %cst_15 [1] : vector<8x8xf32> to vector<8xf32>
    %28 = vector.shape_cast %27 : vector<8xf32> to vector<8x1xf32>
    %29 = vector.broadcast %28 : vector<8x1xf32> to vector<8x8xf32>
    %30 = arith.subf %26, %29 : vector<8x8xf32>
    %31 = math.exp %30 : vector<8x8xf32>
    %cst_16 = arith.constant dense<0.000000e+00> : vector<8xf32>
    %32 = vector.multi_reduction <add>, %31, %cst_16 [1] : vector<8x8xf32> to vector<8xf32>
    %33 = vector.shape_cast %32 : vector<8xf32> to vector<8x1xf32>
    %34 = vector.broadcast %33 : vector<8x1xf32> to vector<8x8xf32>
    %35 = arith.divf %31, %34 : vector<8x8xf32>
    %c0_17 = arith.constant 0 : index
    %c0_18 = arith.constant 0 : index
    %36 = vector.load %arg6[%c0_17, %c0_18] : memref<8x256xf32, #tpu.memory_space<vmem>>, vector<8x256xf32>
    %cst_19 = arith.constant dense<0.000000e+00> : vector<8x256xf32>
    %37 = tpu.matmul %35, %36, %cst_19 {dimension_numbers = #tpu.dot_dimension_numbers<[1], [0], [0], [1], [0, 0, 1, 1], [], []>} : vector<8x8xf32>, vector<8x256xf32>, vector<8x256xf32> -> vector<8x256xf32>
    %38 = arith.mulf %37, %22 : vector<8x256xf32>
    %c0_20 = arith.constant 0 : index
    %c0_21 = arith.constant 0 : index
    %39 = vector.load %arg7[%c0_20, %c0_21] : memref<256x32xf32, #tpu.memory_space<vmem>>, vector<256x32xf32>
    %cst_22 = arith.constant dense<0.000000e+00> : vector<8x32xf32>
    %40 = tpu.matmul %38, %39, %cst_22 {dimension_numbers = #tpu.dot_dimension_numbers<[1], [0], [0], [1], [0, 0, 1, 1], [], []>} : vector<8x256xf32>, vector<256x32xf32>, vector<8x32xf32> -> vector<8x32xf32>
    %41 = vector.extract_strided_slice %18 {offsets = [0, 0], sizes = [8, 32], strides = [1, 1]} : vector<8x256xf32> to vector<8x32xf32>
    %c0_23 = arith.constant 0 : index
    %c0_24 = arith.constant 0 : index
    %42 = vector.load %arg8[%c0_23, %c0_24] : memref<32x32xf32, #tpu.memory_space<vmem>>, vector<32x32xf32>
    %cst_25 = arith.constant dense<0.000000e+00> : vector<8x32xf32>
    %43 = tpu.matmul %40, %42, %cst_25 {dimension_numbers = #tpu.dot_dimension_numbers<[1], [0], [0], [1], [0, 0, 1, 1], [], []>} : vector<8x32xf32>, vector<32x32xf32>, vector<8x32xf32> -> vector<8x32xf32>
    %44 = arith.addf %41, %43 : vector<8x32xf32>
    %c0_26 = arith.constant 0 : index
    %c0_27 = arith.constant 0 : index
    %45 = vector.load %arg9[%c0_26, %c0_27] : memref<32x8xf32, #tpu.memory_space<vmem>>, vector<32x8xf32>
    %cst_28 = arith.constant dense<0.000000e+00> : vector<8x8xf32>
    %46 = tpu.matmul %44, %45, %cst_28 {dimension_numbers = #tpu.dot_dimension_numbers<[1], [0], [0], [1], [0, 0, 1, 1], [], []>} : vector<8x32xf32>, vector<32x8xf32>, vector<8x8xf32> -> vector<8x8xf32>
    %c0_29 = arith.constant 0 : index
    %c0_30 = arith.constant 0 : index
    %47 = vector.load %arg10[%c0_29, %c0_30] : memref<1x8xf32, #tpu.memory_space<vmem>>, vector<1x8xf32>
    %48 = vector.broadcast %47 : vector<1x8xf32> to vector<8x8xf32>
    %49 = arith.addf %46, %48 : vector<8x8xf32>
    %c0_31 = arith.constant 0 : index
    %c0_32 = arith.constant 0 : index
    %50 = vector.load %arg11[%c0_31, %c0_32] : memref<8x8xf32, #tpu.memory_space<vmem>>, vector<8x8xf32>
    tpu.vector_store %arg11[%c0_31, %c0_32], %49 {strides = array<i32>} : memref<8x8xf32, #tpu.memory_space<vmem>>, vector<8x8xf32>,
    return
  }
  func.func @transform_0(%arg0: i32) -> (i32, i32) {
    %c0_i32 = arith.constant 0 : i32
    %c0_i32_0 = arith.constant 0 : i32
    return %arg0, %c0_i32 : i32, i32
  }
  func.func @transform_1(%arg0: i32) -> (i32, i32) {
    %c0_i32 = arith.constant 0 : i32
    %c0_i32_0 = arith.constant 0 : i32
    %c0_i32_1 = arith.constant 0 : i32
    return %c0_i32, %c0_i32_0 : i32, i32
  }
  func.func @transform_2(%arg0: i32) -> (i32, i32) {
    %c0_i32 = arith.constant 0 : i32
    %c0_i32_0 = arith.constant 0 : i32
    %c0_i32_1 = arith.constant 0 : i32
    return %c0_i32, %c0_i32_0 : i32, i32
  }
  func.func @transform_3(%arg0: i32) -> (i32, i32) {
    %c0_i32 = arith.constant 0 : i32
    %c0_i32_0 = arith.constant 0 : i32
    %c0_i32_1 = arith.constant 0 : i32
    return %c0_i32, %c0_i32_0 : i32, i32
  }
  func.func @transform_4(%arg0: i32) -> (i32, i32) {
    %c0_i32 = arith.constant 0 : i32
    %c0_i32_0 = arith.constant 0 : i32
    %c0_i32_1 = arith.constant 0 : i32
    return %c0_i32, %c0_i32_0 : i32, i32
  }
  func.func @transform_5(%arg0: i32) -> (i32, i32) {
    %c0_i32 = arith.constant 0 : i32
    %c0_i32_0 = arith.constant 0 : i32
    %c0_i32_1 = arith.constant 0 : i32
    return %c0_i32, %c0_i32_0 : i32, i32
  }
  func.func @transform_6(%arg0: i32) -> (i32, i32) {
    %c0_i32 = arith.constant 0 : i32
    %c0_i32_0 = arith.constant 0 : i32
    %c0_i32_1 = arith.constant 0 : i32
    return %c0_i32, %c0_i32_0 : i32, i32
  }
  func.func @transform_7(%arg0: i32) -> (i32, i32) {
    %c0_i32 = arith.constant 0 : i32
    %c0_i32_0 = arith.constant 0 : i32
    %c0_i32_1 = arith.constant 0 : i32
    return %c0_i32, %c0_i32_0 : i32, i32
  }
  func.func @transform_8(%arg0: i32) -> (i32, i32) {
    %c0_i32 = arith.constant 0 : i32
    %c0_i32_0 = arith.constant 0 : i32
    %c0_i32_1 = arith.constant 0 : i32
    return %c0_i32, %c0_i32_0 : i32, i32
  }
  func.func @transform_9(%arg0: i32) -> (i32, i32) {
    %c0_i32 = arith.constant 0 : i32
    %c0_i32_0 = arith.constant 0 : i32
    %c0_i32_1 = arith.constant 0 : i32
    return %c0_i32, %c0_i32_0 : i32, i32
  }
  func.func @transform_10(%arg0: i32) -> (i32, i32) {
    %c0_i32 = arith.constant 0 : i32
    %c0_i32_0 = arith.constant 0 : i32
    return %arg0, %c0_i32 : i32, i32
  }
}

</mosaic_0001>

<bundles_post_ra>
// kernel: tpu_custom_call.1
= control target key start
LH: loop header
LB: loop body
LE: loop exit
PB: predicated region body
PF: predicated region fallthrough
CT: control target
= control target key end

     0   :  { %15 = vsyncpa [#allocation3], 0  ;;  %s1593_s0 = inlined_call_operand.vmem [shape: f32[8,64], index: 0, kind: input, shape index: {}]   ;;  %s1594_s1 = inlined_call_operand.vmem [shape: f32[64,256], index: 1, kind: input, shape index: {}]   ;;  %s1595_s2 = inlined_call_operand.vmem [shape: f32[1,256], index: 2, kind: input, shape index: {}]   ;;  %s1596_s3 = inlined_call_operand.hbm [shape: f32[256,768], index: 3, kind: input, shape index: {}]   ;;  %s1597_s4 = inlined_call_operand.vmem [shape: f32[256,8], index: 4, kind: input, shape index: {}]   ;;  %s1598_s5 = inlined_call_operand.vmem [shape: f32[8,256], index: 5, kind: input, shape index: {}]   ;;  %s1599_s6 = inlined_call_operand.vmem [shape: f32[256,32], index: 6, kind: input, shape index: {}]   ;;  %s1600_s7 = inlined_call_operand.vmem [shape: f32[32,32], index: 7, kind: input, shape index: {}]   ;;  %s1601_s8 = inlined_call_operand.vmem [shape: f32[32,8], index: 8, kind: input, shape index: {}]   ;;  %s1602_s9 = inlined_call_operand.vmem [shape: f32[1,8], index: 9, kind: input, shape index: {}]   ;;  %s1603_s10 = inlined_call_operand.hbm [shape: f32[8,8], index: 10, kind: output, shape index: {}]  }
   0x1   :  { %16 = vsyncpa [#allocation4], 0  ;;  %s1217_s13 = smov [#allocation2]  }
   0x2   :  { %s28_s14 = sshll.u32 %s1217_s13, 4  ;;  %s29_s14 = int_to_ptr.vmem [resolvable:$true] %s28_s14 }
   0x3   :  { %s1181_s15 = scalar_lea.vmem %s29_s14, 24576  ;;  %p1186_p1 = scmp.lt.s32.totalorder %s29_s14, %s29_s14 }
   0x4   :  { %p1182_p0 = scmp.ne.s32.totalorder %s29_s14, %s1181_s15  ;;  %p1187_p2 = scmp.lt.s32.totalorder %s1181_s15, %s1181_s15 }
   0x6   :  { %p1188_p3 = por %p1187_p2, %p1186_p1 }
   0x8   :  { %p1189_p4 = pnand %p1188_p3, %p1182_p0 }
   0xa   :  { %1192 = shalt.err (!%p1189_p4)
}
   0xb   :  { %s1218_s16 = smov 768   ;;  %s1219_s17 = smov 48  }
   0xc   :  { %34 = dma.hbm_to_vmem [thread:$0]  %s1596_s3, 24576, %s29_s14, [#allocation3], %s1218_s16, %s1218_s16, %s1219_s17  }
   0xd   :  { %1213 = dma.done.wait [#allocation3], 24576  }
   0xe   :  { %1214 = vsyncadd [#allocation3], 4294942720  ;;  %v1220_v0 = vmov 0.0   ;;  %v66_v1 = vld [vmem:[%s1594_s1 + $0x78] sm:$0xff]  ;;  %v65_v2 = vld [vmem:[%s1594_s1 + $0x70] sm:$0xff]  ;;  %vm79_vm0 = vcmask 523264  }
   0xf   :  { %147 = vmatprep.mubr.f32.mxu0 %v1220_v0  ;;  %v64_v3 = vld [vmem:[%s1594_s1 + $0x68] sm:$0xff]  ;;  %99 = vmatprep.subr.mxu0 %v66_v1  ;;  %v63_v4 = vld [vmem:[%s1594_s1 + $0x60] sm:$0xff]  ;;  %v62_v5 = vld [vmem:[%s1594_s1 + $0x58] sm:$0xff]  ;;  %vm681_vm1 = vcmask 64512   ;;  %vm1221_vm2 = vmmov 0   ;;  %vm877_vm3 = vcmask 261120  }
  0x10   :  { %100 = vmatpush1.msra.mxu0 %v65_v2  ;;  %v61_v6 = vld [vmem:[%s1594_s1 + $0x50] sm:$0xff]  ;;  %v60_v7 = vld [vmem:[%s1594_s1 + $0x48] sm:$0xff]  ;;  %v59_v8 = vld [vmem:[%s1594_s1 + $0x40] sm:$0xff]  ;;  %s1222_s11 = smov [#allocation5]  }
  0x11   :  { %101 = vmatprep.subr.mxu0 %v64_v3  ;;  %v263_v9 = vld [vmem:[#allocation2 + $0x2d8] sm:$0xff]  ;;  %v262_v11 = vld [vmem:[#allocation2 + $0x2d0] sm:$0xff]  ;;  %v257_v12 = vld [vmem:[#allocation2 + $0x2a8] sm:$0xff] }
  0x12   :  { %102 = vmatpush1.msra.mxu0 %v63_v4  ;;  %v58_v10 = vld [vmem:[%s1594_s1 + $0x38] sm:$0xff]  ;;  %364 = vmatprep.subr.mxu1 %v263_v9  ;;  %v57_v13 = vld [vmem:[%s1594_s1 + $0x30] sm:$0xff]  ;;  %v256_v14 = vld [vmem:[#allocation2 + $0x2a0] sm:$0xff] }
  0x13   :  { %103 = vmatprep.subr.mxu0 %v62_v5  ;;  %365 = vmatpush1.msra.mxu1 %v262_v11  ;;  %v56_v15 = vld [vmem:[%s1594_s1 + $0x28] sm:$0xff]  ;;  %v251_v16 = vld [vmem:[#allocation2 + $0x278] sm:$0xff]  ;;  %v250_v17 = vld [vmem:[#allocation2 + $0x270] sm:$0xff] }
  0x14   :  { %104 = vmatpush1.msra.mxu0 %v61_v6  ;;  %366 = vmatprep.subr.mxu1 %v257_v12  ;;  %v55_v18 = vld [vmem:[%s1594_s1 + $0x20] sm:$0xff]  ;;  %v245_v19 = vld [vmem:[#allocation2 + $0x248] sm:$0xff]  ;;  %v54_v20 = vld [vmem:[%s1594_s1 + $0x18] sm:$0xff] }
  0x15   :  { %105 = vmatprep.subr.mxu0 %v60_v7  ;;  %367 = vmatpush1.msra.mxu1 %v256_v14  ;;  %v244_v21 = vld [vmem:[#allocation2 + $0x240] sm:$0xff]  ;;  %v53_v22 = vld [vmem:[%s1594_s1 + $0x10] sm:$0xff]  ;;  %v239_v23 = vld [vmem:[#allocation2 + $0x218] sm:$0xff] }
  0x16   :  { %106 = vmatpush1.msra.mxu0 %v59_v8  ;;  %368 = vmatprep.subr.mxu1 %v251_v16  ;;  %v52_v24 = vld [vmem:[%s1594_s1 + $0x8] sm:$0xff]  ;;  %v238_v25 = vld [vmem:[#allocation2 + $0x210] sm:$0xff]  ;;  %v51_v26 = vld [vmem:[%s1594_s1] sm:$0xff] }
  0x17   :  { %107 = vmatprep.subr.mxu0 %v58_v10  ;;  %369 = vmatpush1.msra.mxu1 %v250_v17  ;;  %v233_v27 = vld [vmem:[#allocation2 + $0x1e8] sm:$0xff]  ;;  %v50_v28 = vld [vmem:[%s1593_s0] sm:$0xff]  ;;  %v259_v32 = vld [vmem:[#allocation2 + $0x2b8] sm:$0xff]  ;;  %s1043_s0 = sshll.u32 %s1222_s11, 4  ;;  %s1044_s0 = int_to_ptr.vmem [resolvable:$true] %s1043_s0 }
  0x18   :  { %108 = vmatpush1.msra.mxu0 %v57_v13  ;;  %370 = vmatprep.subr.mxu1 %v245_v19  ;;  %v265_v29 = vld [vmem:[#allocation2 + $0x2e8] sm:$0xff]  ;;  %v264_v30 = vld [vmem:[#allocation2 + $0x2e0] sm:$0xff]  ;;  %v227_v33 = vld [vmem:[#allocation2 + $0x1b8] sm:$0xff]  ;;  %p1198_p6 = scmp.lt.s32.totalorder %s1044_s0, %s1044_s0 }
  0x19   :  { %109 = vmatprep.subr.mxu0 %v56_v15  ;;  %371 = vmatpush1.msra.mxu1 %v244_v21  ;;  %v232_v31 = vld [vmem:[#allocation2 + $0x1e0] sm:$0xff]  ;;  %v258_v34 = vld [vmem:[#allocation2 + $0x2b0] sm:$0xff]  ;;  %v253_v36 = vld [vmem:[#allocation2 + $0x288] sm:$0xff] }
  0x1a   :  { %110 = vmatpush1.msra.mxu0 %v55_v18  ;;  %372 = vmatprep.subr.mxu1 %v239_v23  ;;  %v226_v35 = vld [vmem:[#allocation2 + $0x1b0] sm:$0xff]  ;;  %v221_v37 = vld [vmem:[#allocation2 + $0x188] sm:$0xff]  ;;  %v252_v38 = vld [vmem:[#allocation2 + $0x280] sm:$0xff] }
  0x1b   :  { %111 = vmatprep.subr.mxu0 %v54_v20  ;;  %373 = vmatpush1.msra.mxu1 %v238_v25  ;;  %v220_v39 = vld [vmem:[#allocation2 + $0x180] sm:$0xff]  ;;  %v247_v40 = vld [vmem:[#allocation2 + $0x258] sm:$0xff]  ;;  %v246_v42 = vld [vmem:[#allocation2 + $0x250] sm:$0xff] }
  0x1c   :  { %112 = vmatpush1.msra.mxu0 %v53_v22  ;;  %374 = vmatprep.subr.mxu1 %v233_v27  ;;  %v215_v41 = vld [vmem:[#allocation2 + $0x158] sm:$0xff]  ;;  %v214_v43 = vld [vmem:[#allocation2 + $0x150] sm:$0xff]  ;;  %v241_v44 = vld [vmem:[#allocation2 + $0x228] sm:$0xff] }
  0x1d   :  { %113 = vmatprep.subr.mxu0 %v52_v24  ;;  %375 = vmatpush1.msra.mxu1 %v232_v31  ;;  %v209_v45 = vld [vmem:[#allocation2 + $0x128] sm:$0xff]  ;;  %v240_v46 = vld [vmem:[#allocation2 + $0x220] sm:$0xff]  ;;  %v235_v48 = vld [vmem:[#allocation2 + $0x1f8] sm:$0xff] }
  0x1e   :  { %114 = vmatpush1.msra.mxu0 %v51_v26  ;;  %376 = vmatprep.subr.mxu1 %v227_v33  ;;  %v208_v47 = vld [vmem:[#allocation2 + $0x120] sm:$0xff]  ;;  %v203_v49 = vld [vmem:[#allocation2 + $0xf8] sm:$0xff]  ;;  %v234_v50 = vld [vmem:[#allocation2 + $0x1f0] sm:$0xff] }
  0x1f   :  { %1052 = vmatmul.mubr.msk.f32.vlgmr.msra.gmra.mxu0 %vm79_vm0, %v50_v28  ;;  %435 = vmatprep.subr.mxu0 %v265_v29  ;;  %v202_v51 = vld [vmem:[#allocation2 + $0xf0] sm:$0xff]  ;;  %v229_v52 = vld [vmem:[#allocation2 + $0x1c8] sm:$0xff]  ;;  %v228_v54 = vld [vmem:[#allocation2 + $0x1c0] sm:$0xff] }
  0x20   :  { %436 = vmatpush1.msra.mxu0 %v264_v30  ;;  %377 = vmatpush1.msra.mxu1 %v226_v35  ;;  %v197_v53 = vld [vmem:[#allocation2 + $0xc8] sm:$0xff]  ;;  %v196_v55 = vld [vmem:[#allocation2 + $0xc0] sm:$0xff]  ;;  %v223_v56 = vld [vmem:[#allocation2 + $0x198] sm:$0xff] }
  0x21   :  { %437 = vmatprep.subr.mxu0 %v259_v32  ;;  %378 = vmatprep.subr.mxu1 %v221_v37  ;;  %v191_v57 = vld [vmem:[#allocation2 + $0x98] sm:$0xff]  ;;  %v222_v58 = vld [vmem:[#allocation2 + $0x190] sm:$0xff]  ;;  %v217_v60 = vld [vmem:[#allocation2 + $0x168] sm:$0xff] }
  0x22   :  { %438 = vmatpush1.msra.mxu0 %v258_v34  ;;  %379 = vmatpush1.msra.mxu1 %v220_v39  ;;  %v190_v59 = vld [vmem:[#allocation2 + $0x90] sm:$0xff]  ;;  %v185_v61 = vld [vmem:[#allocation2 + $0x68] sm:$0xff]  ;;  %v216_v62 = vld [vmem:[#allocation2 + $0x160] sm:$0xff] }
  0x23   :  { %439 = vmatprep.subr.mxu0 %v253_v36  ;;  %380 = vmatprep.subr.mxu1 %v215_v41  ;;  %v184_v63 = vld [vmem:[#allocation2 + $0x60] sm:$0xff]  ;;  %v211_v1 = vld [vmem:[#allocation2 + $0x138] sm:$0xff]  ;;  %v210_v3 = vld [vmem:[#allocation2 + $0x130] sm:$0xff] }
  0x24   :  { %440 = vmatpush1.msra.mxu0 %v252_v38  ;;  %381 = vmatpush1.msra.mxu1 %v214_v43  ;;  %v179_v2 = vld [vmem:[#allocation2 + $0x38] sm:$0xff]  ;;  %v205_v4 = vld [vmem:[#allocation2 + $0x108] sm:$0xff]  ;;  %v204_v5 = vld [vmem:[#allocation2 + $0x100] sm:$0xff] }
  0x25   :  { %441 = vmatprep.subr.mxu0 %v247_v40  ;;  %382 = vmatprep.subr.mxu1 %v209_v45  ;;  %v199_v6 = vld [vmem:[#allocation2 + $0xd8] sm:$0xff]  ;;  %v198_v7 = vld [vmem:[#allocation2 + $0xd0] sm:$0xff]  ;;  %v193_v8 = vld [vmem:[#allocation2 + $0xa8] sm:$0xff] }
  0x26   :  { %442 = vmatpush1.msra.mxu0 %v246_v42  ;;  %383 = vmatpush1.msra.mxu1 %v208_v47  ;;  %v192_v9 = vld [vmem:[#allocation2 + $0xa0] sm:$0xff]  ;;  %v187_v10 = vld [vmem:[#allocation2 + $0x78] sm:$0xff]  ;;  %v186_v11 = vld [vmem:[#allocation2 + $0x70] sm:$0xff] }
  0x27   :  { %443 = vmatprep.subr.mxu0 %v241_v44  ;;  %384 = vmatprep.subr.mxu1 %v203_v49  ;;  %v178_v12 = vld [vmem:[#allocation2 + $0x30] sm:$0xff]  ;;  %v181_v13 = vld [vmem:[#allocation2 + $0x48] sm:$0xff]  ;;  %v180_v15 = vld [vmem:[#allocation2 + $0x40] sm:$0xff] }
  0x28   :  { %444 = vmatpush1.msra.mxu0 %v240_v46  ;;  %385 = vmatpush1.msra.mxu1 %v202_v51  ;;  %v173_v14 = vld [vmem:[#allocation2 + $0x8] sm:$0xff]  ;;  %v172_v16 = vld [vmem:[#allocation2] sm:$0xff]  ;;  %v175_v17 = vld [vmem:[#allocation2 + $0x18] sm:$0xff] }
  0x29   :  { %445 = vmatprep.subr.mxu0 %v235_v48  ;;  %386 = vmatprep.subr.mxu1 %v197_v53  ;;  %v359_v18 = vld [vmem:[#allocation2 + $0x5d8] sm:$0xff]  ;;  %v174_v19 = vld [vmem:[#allocation2 + $0x10] sm:$0xff]  ;;  %v361_v21 = vld [vmem:[#allocation2 + $0x5e8] sm:$0xff] }
  0x2a   :  { %446 = vmatpush1.msra.mxu0 %v234_v50  ;;  %387 = vmatpush1.msra.mxu1 %v196_v55  ;;  %v358_v20 = vld [vmem:[#allocation2 + $0x5d0] sm:$0xff]  ;;  %v353_v22 = vld [vmem:[#allocation2 + $0x5a8] sm:$0xff]  ;;  %v360_v23 = vld [vmem:[#allocation2 + $0x5e0] sm:$0xff] }
  0x2b   :  { %447 = vmatprep.subr.mxu0 %v229_v52  ;;  %388 = vmatprep.subr.mxu1 %v191_v57  ;;  %v352_v24 = vld [vmem:[#allocation2 + $0x5a0] sm:$0xff]  ;;  %v355_v25 = vld [vmem:[#allocation2 + $0x5b8] sm:$0xff]  ;;  %v354_v27 = vld [vmem:[#allocation2 + $0x5b0] sm:$0xff] }
  0x2c   :  { %448 = vmatpush1.msra.mxu0 %v228_v54  ;;  %389 = vmatpush1.msra.mxu1 %v190_v59  ;;  %v347_v26 = vld [vmem:[#allocation2 + $0x578] sm:$0xff]  ;;  %v346_v28 = vld [vmem:[#allocation2 + $0x570] sm:$0xff]  ;;  %v349_v29 = vld [vmem:[#allocation2 + $0x588] sm:$0xff] }
  0x2d   :  { %449 = vmatprep.subr.mxu0 %v223_v56  ;;  %390 = vmatprep.subr.mxu1 %v185_v61  ;;  %v341_v30 = vld [vmem:[#allocation2 + $0x548] sm:$0xff]  ;;  %v348_v31 = vld [vmem:[#allocation2 + $0x580] sm:$0xff]  ;;  %v343_v33 = vld [vmem:[#allocation2 + $0x558] sm:$0xff] }
  0x2e   :  { %450 = vmatpush1.msra.mxu0 %v222_v58  ;;  %391 = vmatpush1.msra.mxu1 %v184_v63  ;;  %v340_v32 = vld [vmem:[#allocation2 + $0x540] sm:$0xff]  ;;  %v335_v34 = vld [vmem:[#allocation2 + $0x518] sm:$0xff]  ;;  %v342_v35 = vld [vmem:[#allocation2 + $0x550] sm:$0xff] }
  0x2f   :  { %451 = vmatprep.subr.mxu0 %v217_v60  ;;  %392 = vmatprep.subr.mxu1 %v179_v2  ;;  %v334_v36 = vld [vmem:[#allocation2 + $0x510] sm:$0xff]  ;;  %v337_v37 = vld [vmem:[#allocation2 + $0x528] sm:$0xff]  ;;  %v336_v39 = vld [vmem:[#allocation2 + $0x520] sm:$0xff] }
  0x30   :  { %452 = vmatpush1.msra.mxu0 %v216_v62  ;;  %393 = vmatpush1.msra.mxu1 %v178_v12  ;;  %v329_v38 = vld [vmem:[#allocation2 + $0x4e8] sm:$0xff]  ;;  %v328_v40 = vld [vmem:[#allocation2 + $0x4e0] sm:$0xff]  ;;  %v331_v41 = vld [vmem:[#allocation2 + $0x4f8] sm:$0xff] }
  0x31   :  { %453 = vmatprep.subr.mxu0 %v211_v1  ;;  %394 = vmatprep.subr.mxu1 %v173_v14  ;;  %v323_v42 = vld [vmem:[#allocation2 + $0x4b8] sm:$0xff]  ;;  %v330_v43 = vld [vmem:[#allocation2 + $0x4f0] sm:$0xff]  ;;  %v325_v45 = vld [vmem:[#allocation2 + $0x4c8] sm:$0xff] }
  0x32   :  { %454 = vmatpush1.msra.mxu0 %v210_v3  ;;  %395 = vmatpush1.msra.mxu1 %v172_v16  ;;  %v322_v44 = vld [vmem:[#allocation2 + $0x4b0] sm:$0xff]  ;;  %v317_v46 = vld [vmem:[#allocation2 + $0x488] sm:$0xff]  ;;  %v324_v47 = vld [vmem:[#allocation2 + $0x4c0] sm:$0xff] }
  0x33   :  { %455 = vmatprep.subr.mxu0 %v205_v4  ;;  %396 = vmatprep.subr.mxu1 %v359_v18  ;;  %v316_v48 = vld [vmem:[#allocation2 + $0x480] sm:$0xff]  ;;  %v319_v49 = vld [vmem:[#allocation2 + $0x498] sm:$0xff]  ;;  %v318_v51 = vld [vmem:[#allocation2 + $0x490] sm:$0xff] }
  0x34   :  { %456 = vmatpush1.msra.mxu0 %v204_v5  ;;  %397 = vmatpush2.msra.mxu1 %v358_v20  ;;  %v311_v50 = vld [vmem:[#allocation2 + $0x458] sm:$0xff]  ;;  %v310_v52 = vld [vmem:[#allocation2 + $0x450] sm:$0xff]  ;;  %v313_v53 = vld [vmem:[#allocation2 + $0x468] sm:$0xff] }
  0x35   :  { %457 = vmatprep.subr.mxu0 %v199_v6  ;;  %398 = vmatprep.subr.mxu1 %v353_v22  ;;  %v305_v54 = vld [vmem:[#allocation2 + $0x428] sm:$0xff]  ;;  %v312_v55 = vld [vmem:[#allocation2 + $0x460] sm:$0xff]  ;;  %v307_v57 = vld [vmem:[#allocation2 + $0x438] sm:$0xff] }
  0x36   :  { %458 = vmatpush1.msra.mxu0 %v198_v7  ;;  %399 = vmatpush2.msra.mxu1 %v352_v24  ;;  %v304_v56 = vld [vmem:[#allocation2 + $0x420] sm:$0xff]  ;;  %v299_v58 = vld [vmem:[#allocation2 + $0x3f8] sm:$0xff]  ;;  %v306_v59 = vld [vmem:[#allocation2 + $0x430] sm:$0xff] }
  0x37   :  { %459 = vmatprep.subr.mxu0 %v193_v8  ;;  %400 = vmatprep.subr.mxu1 %v347_v26  ;;  %v298_v60 = vld [vmem:[#allocation2 + $0x3f0] sm:$0xff]  ;;  %v301_v61 = vld [vmem:[#allocation2 + $0x408] sm:$0xff]  ;;  %v300_v63 = vld [vmem:[#allocation2 + $0x400] sm:$0xff] }
  0x38   :  { %460 = vmatpush1.msra.mxu0 %v192_v9  ;;  %401 = vmatpush2.msra.mxu1 %v346_v28  ;;  %v293_v62 = vld [vmem:[#allocation2 + $0x3c8] sm:$0xff]  ;;  %v292_v1 = vld [vmem:[#allocation2 + $0x3c0] sm:$0xff]  ;;  %v295_v2 = vld [vmem:[#allocation2 + $0x3d8] sm:$0xff] }
  0x39   :  { %461 = vmatprep.subr.mxu0 %v187_v10  ;;  %402 = vmatprep.subr.mxu1 %v341_v30  ;;  %v287_v3 = vld [vmem:[#allocation2 + $0x398] sm:$0xff]  ;;  %v294_v4 = vld [vmem:[#allocation2 + $0x3d0] sm:$0xff]  ;;  %v289_v6 = vld [vmem:[#allocation2 + $0x3a8] sm:$0xff] }
  0x3a   :  { %462 = vmatpush1.msra.mxu0 %v186_v11  ;;  %403 = vmatpush2.msra.mxu1 %v340_v32  ;;  %v286_v5 = vld [vmem:[#allocation2 + $0x390] sm:$0xff]  ;;  %v281_v7 = vld [vmem:[#allocation2 + $0x368] sm:$0xff]  ;;  %v288_v8 = vld [vmem:[#allocation2 + $0x3a0] sm:$0xff] }
  0x3b   :  { %463 = vmatprep.subr.mxu0 %v181_v13  ;;  %404 = vmatprep.subr.mxu1 %v335_v34  ;;  %v280_v9 = vld [vmem:[#allocation2 + $0x360] sm:$0xff]  ;;  %v283_v10 = vld [vmem:[#allocation2 + $0x378] sm:$0xff]  ;;  %v282_v12 = vld [vmem:[#allocation2 + $0x370] sm:$0xff] }
  0x3c   :  { %464 = vmatpush1.msra.mxu0 %v180_v15  ;;  %405 = vmatpush2.msra.mxu1 %v334_v36  ;;  %v275_v11 = vld [vmem:[#allocation2 + $0x338] sm:$0xff]  ;;  %v274_v13 = vld [vmem:[#allocation2 + $0x330] sm:$0xff]  ;;  %v277_v14 = vld [vmem:[#allocation2 + $0x348] sm:$0xff] }
  0x3d   :  { %465 = vmatprep.subr.mxu0 %v175_v17  ;;  %406 = vmatprep.subr.mxu1 %v329_v38  ;;  %v269_v15 = vld [vmem:[#allocation2 + $0x308] sm:$0xff]  ;;  %v276_v16 = vld [vmem:[#allocation2 + $0x340] sm:$0xff]  ;;  %v271_v18 = vld [vmem:[#allocation2 + $0x318] sm:$0xff] }
  0x3e   :  { %466 = vmatpush1.msra.mxu0 %v174_v19  ;;  %407 = vmatpush2.msra.mxu1 %v328_v40  ;;  %v268_v17 = vld [vmem:[#allocation2 + $0x300] sm:$0xff]  ;;  %v270_v19 = vld [vmem:[#allocation2 + $0x310] sm:$0xff]  ;;  %v267_v20 = vld [vmem:[#allocation2 + $0x2f8] sm:$0xff] }
  0x3f   :  { %467 = vmatprep.subr.mxu0 %v361_v21  ;;  %408 = vmatprep.subr.mxu1 %v323_v42  ;;  %v69_v21 = vlaneseq  ;;  %v67_v24 = vld [vmem:[%s1595_s2] sm:$0x3] }
  0x40   :  { %468 = vmatpush2.msra.mxu0 %v360_v23  ;;  %409 = vmatpush2.msra.mxu1 %v322_v44 }
  0x41   :  { %469 = vmatprep.subr.mxu0 %v355_v25  ;;  %410 = vmatprep.subr.mxu1 %v317_v46  ;;  %v70_v22 = vshrl.u32 %v69_v21, 7  ;;  %v356_v21 = vld [vmem:[#allocation2 + $0x5c0] sm:$0xff] }
  0x42   :  { %470 = vmatpush2.msra.mxu0 %v354_v27  ;;  %411 = vmatpush2.msra.mxu1 %v316_v48 }
  0x43   :  { %471 = vmatprep.subr.mxu0 %v349_v29  ;;  %412 = vmatprep.subr.mxu1 %v311_v50  ;;  %v71_v23 = vsub.s32 0, %v70_v22  ;;  %v75_v25 = vsub.s32 1, %v70_v22  ;;  %v266_v50 = vld [vmem:[#allocation2 + $0x2f0] sm:$0xff]  ;;  %v351_v22 = vld [vmem:[#allocation2 + $0x598] sm:$0xff] }
  0x44   :  { %472 = vmatpush2.msra.mxu0 %v348_v31  ;;  %413 = vmatpush2.msra.mxu1 %v310_v52  ;;  %v260_v52 = vld [vmem:[#allocation2 + $0x2c0] sm:$0xff] }
  0x45   :  { %473 = vmatprep.subr.mxu0 %v343_v33  ;;  %414 = vmatprep.subr.mxu1 %v305_v54  ;;  %v72_v26 = vrot.slane %v67_v24, %v71_v23  ;;  %v76_v27 = vrot.slane %v67_v24, %v75_v25  ;;  %v254_v54 = vld [vmem:[#allocation2 + $0x290] sm:$0xff]  ;;  %v345_v24 = vld [vmem:[#allocation2 + $0x568] sm:$0xff]  ;;  %v344_v25 = vld [vmem:[#allocation2 + $0x560] sm:$0xff] }
  0x46   :  { %474 = vmatpush2.msra.mxu0 %v342_v35  ;;  %415 = vmatpush2.msra.mxu1 %v304_v56  ;;  %v248_v56 = vld [vmem:[#allocation2 + $0x260] sm:$0xff]  ;;  %v350_v23 = vld [vmem:[#allocation2 + $0x590] sm:$0xff] }
  0x47   :  { %475 = vmatprep.subr.mxu0 %v337_v37  ;;  %416 = vmatprep.subr.mxu1 %v299_v58  ;;  %v242_v58 = vld [vmem:[#allocation2 + $0x230] sm:$0xff] }
  0x48   :  { %476 = vmatpush2.msra.mxu0 %v336_v39  ;;  %417 = vmatpush2.msra.mxu1 %v298_v60  ;;  %v236_v60 = vld [vmem:[#allocation2 + $0x200] sm:$0xff] }
  0x49   :  { %477 = vmatprep.subr.mxu0 %v331_v41  ;;  %418 = vmatprep.subr.mxu1 %v293_v62  ;;  %v230_v62 = vld [vmem:[#allocation2 + $0x1d0] sm:$0xff] }
  0x4a   :  { %478 = vmatpush2.msra.mxu0 %v330_v43  ;;  %419 = vmatpush2.msra.mxu1 %v292_v1  ;;  %v224_v1 = vld [vmem:[#allocation2 + $0x1a0] sm:$0xff] }
  0x4b   :  { %479 = vmatprep.subr.mxu0 %v325_v45  ;;  %420 = vmatprep.subr.mxu1 %v287_v3  ;;  %v218_v3 = vld [vmem:[#allocation2 + $0x170] sm:$0xff] }
  0x4c   :  { %480 = vmatpush2.msra.mxu0 %v324_v47  ;;  %421 = vmatpush2.msra.mxu1 %v286_v5  ;;  %v212_v5 = vld [vmem:[#allocation2 + $0x140] sm:$0xff] }
  0x4d   :  { %481 = vmatprep.subr.mxu0 %v319_v49  ;;  %422 = vmatprep.subr.mxu1 %v281_v7  ;;  %v206_v7 = vld [vmem:[#allocation2 + $0x110] sm:$0xff] }
  0x4e   :  { %482 = vmatpush2.msra.mxu0 %v318_v51  ;;  %423 = vmatpush2.msra.mxu1 %v280_v9  ;;  %v261_v51 = vld [vmem:[#allocation2 + $0x2c8] sm:$0xff]  ;;  %v200_v9 = vld [vmem:[#allocation2 + $0xe0] sm:$0xff] }
  0x4f   :  { %483 = vmatprep.subr.mxu0 %v313_v53  ;;  %424 = vmatprep.subr.mxu1 %v275_v11  ;;  %v255_v53 = vld [vmem:[#allocation2 + $0x298] sm:$0xff]  ;;  %v194_v11 = vld [vmem:[#allocation2 + $0xb0] sm:$0xff] }
  0x50   :  { %484 = vmatpush2.msra.mxu0 %v312_v55  ;;  %425 = vmatpush2.msra.mxu1 %v274_v13  ;;  %v249_v55 = vld [vmem:[#allocation2 + $0x268] sm:$0xff]  ;;  %v188_v13 = vld [vmem:[#allocation2 + $0x80] sm:$0xff] }
  0x51   :  { %485 = vmatprep.subr.mxu0 %v307_v57  ;;  %426 = vmatprep.subr.mxu1 %v269_v15  ;;  %v243_v57 = vld [vmem:[#allocation2 + $0x238] sm:$0xff]  ;;  %v182_v15 = vld [vmem:[#allocation2 + $0x50] sm:$0xff] }
  0x52   :  { %486 = vmatpush2.msra.mxu0 %v306_v59  ;;  %427 = vmatpush2.msra.mxu1 %v268_v17  ;;  %v237_v59 = vld [vmem:[#allocation2 + $0x208] sm:$0xff]  ;;  %v176_v17 = vld [vmem:[#allocation2 + $0x20] sm:$0xff] }
  0x53   :  { %487 = vmatprep.subr.mxu0 %v301_v61  ;;  %506 = vmatprep.subr.mxu1 %v267_v20  ;;  %v231_v61 = vld [vmem:[#allocation2 + $0x1d8] sm:$0xff]  ;;  %v357_v20 = vld [vmem:[#allocation2 + $0x5c8] sm:$0xff] }
  0x54   :  { %488 = vmatpush2.msra.mxu0 %v300_v63  ;;  %v225_v63 = vld [vmem:[#allocation2 + $0x1a8] sm:$0xff] }
  0x55   :  { %489 = vmatprep.subr.mxu0 %v295_v2  ;;  %v219_v2 = vld [vmem:[#allocation2 + $0x178] sm:$0xff] }
  0x56   :  { %490 = vmatpush2.msra.mxu0 %v294_v4  ;;  %v213_v4 = vld [vmem:[#allocation2 + $0x148] sm:$0xff] }
  0x57   :  { %491 = vmatprep.subr.mxu0 %v289_v6  ;;  %v207_v6 = vld [vmem:[#allocation2 + $0x118] sm:$0xff] }
  0x58   :  { %492 = vmatpush2.msra.mxu0 %v288_v8  ;;  %v201_v8 = vld [vmem:[#allocation2 + $0xe8] sm:$0xff] }
  0x59   :  { %493 = vmatprep.subr.mxu0 %v283_v10  ;;  %v195_v10 = vld [vmem:[#allocation2 + $0xb8] sm:$0xff] }
  0x5a   :  { %494 = vmatpush2.msra.mxu0 %v282_v12  ;;  %v189_v12 = vld [vmem:[#allocation2 + $0x88] sm:$0xff] }
  0x5b   :  { %495 = vmatprep.subr.mxu0 %v277_v14  ;;  %v183_v14 = vld [vmem:[#allocation2 + $0x58] sm:$0xff] }
  0x5c   :  { %496 = vmatpush2.msra.mxu0 %v276_v16  ;;  %v177_v16 = vld [vmem:[#allocation2 + $0x28] sm:$0xff] }
  0x5d   :  { %497 = vmatprep.subr.mxu0 %v271_v18  ;;  %v363_v18 = vld [vmem:[#allocation2 + $0x5f8] sm:$0xff] }
  0x5e   :  { %498 = vmatpush2.msra.mxu0 %v270_v19  ;;  %v362_v19 = vld [vmem:[#allocation2 + $0x5f0] sm:$0xff] }
  0xdf   :  { %v149_v28 = vpop.f32.mrf.mxu0 }
  0xe0   :  { %v150_v29 = vadd.f32 %v149_v28, %v72_v26  ;;  %v339_v26 = vld [vmem:[#allocation2 + $0x538] sm:$0xff]  ;;  %v333_v28 = vld [vmem:[#allocation2 + $0x508] sm:$0xff] }
  0xe1   :  { %v151_v30 = vpop.f32.mrf.mxu0 }
  0xe2   :  { %v154_v31 = vmul.f32 %v150_v29, %v150_v29  ;;  %v152_v32 = vadd.f32 %v151_v30, %v76_v27  ;;  %v338_v27 = vld [vmem:[#allocation2 + $0x530] sm:$0xff]  ;;  %v327_v30 = vld [vmem:[#allocation2 + $0x4d8] sm:$0xff] }
  0xe4   :  { %v156_v33 = vmul.f32 %v154_v31, %v150_v29  ;;  %v155_v34 = vmul.f32 %v152_v32, %v152_v32  ;;  %v326_v31 = vld [vmem:[#allocation2 + $0x4d0] sm:$0xff] }
  0xe6   :  { %v158_v35 = vmul.f32 0.044715, %v156_v33  ;;  %v157_v36 = vmul.f32 %v155_v34, %v152_v32  ;;  %v320_v33 = vld [vmem:[#allocation2 + $0x4a0] sm:$0xff]  ;;  %v315_v34 = vld [vmem:[#allocation2 + $0x478] sm:$0xff] }
  0xe8   :  { %v160_v37 = vadd.f32 %v158_v35, %v150_v29  ;;  %v159_v38 = vmul.f32 0.044715, %v157_v36  ;;  %v314_v35 = vld [vmem:[#allocation2 + $0x470] sm:$0xff]  ;;  %v309_v36 = vld [vmem:[#allocation2 + $0x448] sm:$0xff] }
  0xea   :  { %v162_v39 = vmul.f32 0.7978846, %v160_v37  ;;  %v161_v40 = vadd.f32 %v159_v38, %v152_v32  ;;  %v308_v37 = vld [vmem:[#allocation2 + $0x440] sm:$0xff]  ;;  %v303_v38 = vld [vmem:[#allocation2 + $0x418] sm:$0xff] }
  0xec   :  { %1165 = vtanh.f32 %v162_v39  ;;  %v163_v41 = vmul.f32 0.7978846, %v161_v40  ;;  %v302_v39 = vld [vmem:[#allocation2 + $0x410] sm:$0xff]  ;;  %v297_v40 = vld [vmem:[#allocation2 + $0x3e8] sm:$0xff] }
  0xee   :  { %1167 = vtanh.f32 %v163_v41  ;;  %v296_v41 = vld [vmem:[#allocation2 + $0x3e0] sm:$0xff] }
  0xf9   :  { %v1166_v42 = vpop.eup %1165 }
  0xfa   :  { %v166_v43 = vadd.f32 1.0, %v1166_v42  ;;  %v291_v42 = vld [vmem:[#allocation2 + $0x3b8] sm:$0xff] }
  0xfb   :  { %v1168_v44 = vpop.eup %1167 }
  0xfc   :  { %v167_v45 = vadd.f32 1.0, %v1168_v44  ;;  %v168_v46 = vmul.f32 0.5, %v166_v43  ;;  %v290_v43 = vld [vmem:[#allocation2 + $0x3b0] sm:$0xff]  ;;  %v285_v44 = vld [vmem:[#allocation2 + $0x388] sm:$0xff] }
  0xfe   :  { %v169_v47 = vmul.f32 0.5, %v167_v45  ;;  %v1336_v49 = vmul.f32 %v168_v46, %v150_v29  ;;  %v332_v29 = vld [vmem:[#allocation2 + $0x500] sm:$0xff]  ;;  %v279_v46 = vld [vmem:[#allocation2 + $0x358] sm:$0xff] }
  0xff   :  { %v284_v45 = vld [vmem:[#allocation2 + $0x380] sm:$0xff] }
 0x100   :  { %v171_v48 = vmul.f32 %v169_v47, %v152_v32  ;;  %v321_v32 = vld [vmem:[#allocation2 + $0x4a8] sm:$0xff]  ;;  %v278_v47 = vld [vmem:[#allocation2 + $0x350] sm:$0xff] }
 0x102   :  { %428 = vmatprep.mubr.f32.mxu1 %v171_v48  ;;  %499 = vmatprep.mubr.f32.mxu0 %v171_v48 }
 0x103   :  { %429 = vmatmul.mubr.f32.vlgmr.msra.gmra.mxu1 %v1336_v49  ;;  %500 = vmatmul.mubr.f32.vlgmr.msra.gmra.mxu0 %v1336_v49 }
 0x104   :  { %507 = vmatpush1.msra.mxu1 %v266_v50  ;;  %570 = vmatprep.mubr.f32.mxu1 %v171_v48  ;;  %v273_v48 = vld [vmem:[#allocation2 + $0x328] sm:$0xff]  ;;  %v272_v50 = vld [vmem:[#allocation2 + $0x320] sm:$0xff] }
 0x105   :  { %508 = vmatprep.subr.mxu1 %v261_v51  ;;  %v610_v51 = vld [vmem:[%s1597_s4 + $0xf8] sm:$0xff] }
 0x106   :  { %509 = vmatpush1.msra.mxu1 %v260_v52  ;;  %v594_v52 = vld [vmem:[%s1597_s4 + $0x78] sm:$0xff]  ;;  %1057 = vmatprep.subr.mxu0 %v610_v51 }
 0x107   :  { %510 = vmatprep.subr.mxu1 %v255_v53  ;;  %v609_v53 = vld [vmem:[%s1597_s4 + $0xf0] sm:$0xff]  ;;  %1058 = vmatpush3.msra.mxu0 %v594_v52  ;;  %v798_v51 = vld [vmem:[%s1599_s6 + $0xd8] sm:$0xff] }
 0x108   :  { %511 = vmatpush1.msra.mxu1 %v254_v54  ;;  %v593_v54 = vld [vmem:[%s1597_s4 + $0x70] sm:$0xff]  ;;  %1059 = vmatprep.subr.mxu0 %v609_v53  ;;  %v782_v52 = vld [vmem:[%s1599_s6 + $0x58] sm:$0xff] }
 0x109   :  { %512 = vmatprep.subr.mxu1 %v249_v55  ;;  %v608_v55 = vld [vmem:[%s1597_s4 + $0xe8] sm:$0xff]  ;;  %1060 = vmatpush3.msra.mxu0 %v593_v54  ;;  %v797_v53 = vld [vmem:[%s1599_s6 + $0xd0] sm:$0xff] }
 0x10a   :  { %513 = vmatpush1.msra.mxu1 %v248_v56  ;;  %v592_v56 = vld [vmem:[%s1597_s4 + $0x68] sm:$0xff]  ;;  %1061 = vmatprep.subr.mxu0 %v608_v55  ;;  %v781_v54 = vld [vmem:[%s1599_s6 + $0x50] sm:$0xff] }
 0x10b   :  { %514 = vmatprep.subr.mxu1 %v243_v57  ;;  %v607_v57 = vld [vmem:[%s1597_s4 + $0xe0] sm:$0xff]  ;;  %1062 = vmatpush3.msra.mxu0 %v592_v56  ;;  %v796_v55 = vld [vmem:[%s1599_s6 + $0xc8] sm:$0xff] }
 0x10c   :  { %515 = vmatpush1.msra.mxu1 %v242_v58  ;;  %v591_v58 = vld [vmem:[%s1597_s4 + $0x60] sm:$0xff]  ;;  %1063 = vmatprep.subr.mxu0 %v607_v57  ;;  %v780_v56 = vld [vmem:[%s1599_s6 + $0x48] sm:$0xff] }
 0x10d   :  { %516 = vmatprep.subr.mxu1 %v237_v59  ;;  %v606_v59 = vld [vmem:[%s1597_s4 + $0xd8] sm:$0xff]  ;;  %1064 = vmatpush3.msra.mxu0 %v591_v58  ;;  %v795_v57 = vld [vmem:[%s1599_s6 + $0xc0] sm:$0xff] }
 0x10e   :  { %517 = vmatpush1.msra.mxu1 %v236_v60  ;;  %v590_v60 = vld [vmem:[%s1597_s4 + $0x58] sm:$0xff]  ;;  %1065 = vmatprep.subr.mxu0 %v606_v59  ;;  %v779_v58 = vld [vmem:[%s1599_s6 + $0x40] sm:$0xff] }
 0x10f   :  { %518 = vmatprep.subr.mxu1 %v231_v61  ;;  %v605_v61 = vld [vmem:[%s1597_s4 + $0xd0] sm:$0xff]  ;;  %1066 = vmatpush3.msra.mxu0 %v590_v60  ;;  %v794_v59 = vld [vmem:[%s1599_s6 + $0xb8] sm:$0xff] }
 0x110   :  { %519 = vmatpush1.msra.mxu1 %v230_v62  ;;  %v589_v62 = vld [vmem:[%s1597_s4 + $0x50] sm:$0xff]  ;;  %1067 = vmatprep.subr.mxu0 %v605_v61  ;;  %v778_v60 = vld [vmem:[%s1599_s6 + $0x38] sm:$0xff] }
 0x111   :  { %520 = vmatprep.subr.mxu1 %v225_v63  ;;  %v604_v63 = vld [vmem:[%s1597_s4 + $0xc8] sm:$0xff]  ;;  %1068 = vmatpush3.msra.mxu0 %v589_v62  ;;  %v793_v61 = vld [vmem:[%s1599_s6 + $0xb0] sm:$0xff] }
 0x112   :  { %521 = vmatpush1.msra.mxu1 %v224_v1  ;;  %v588_v1 = vld [vmem:[%s1597_s4 + $0x48] sm:$0xff]  ;;  %1069 = vmatprep.subr.mxu0 %v604_v63  ;;  %v777_v62 = vld [vmem:[%s1599_s6 + $0x30] sm:$0xff] }
 0x113   :  { %522 = vmatprep.subr.mxu1 %v219_v2  ;;  %v603_v2 = vld [vmem:[%s1597_s4 + $0xc0] sm:$0xff]  ;;  %1070 = vmatpush3.msra.mxu0 %v588_v1  ;;  %v792_v63 = vld [vmem:[%s1599_s6 + $0xa8] sm:$0xff] }
 0x114   :  { %523 = vmatpush1.msra.mxu1 %v218_v3  ;;  %v587_v3 = vld [vmem:[%s1597_s4 + $0x40] sm:$0xff]  ;;  %1071 = vmatprep.subr.mxu0 %v603_v2  ;;  %v776_v1 = vld [vmem:[%s1599_s6 + $0x28] sm:$0xff] }
 0x115   :  { %524 = vmatprep.subr.mxu1 %v213_v4  ;;  %v602_v4 = vld [vmem:[%s1597_s4 + $0xb8] sm:$0xff]  ;;  %1072 = vmatpush3.msra.mxu0 %v587_v3  ;;  %v791_v2 = vld [vmem:[%s1599_s6 + $0xa0] sm:$0xff] }
 0x116   :  { %525 = vmatpush1.msra.mxu1 %v212_v5  ;;  %v586_v5 = vld [vmem:[%s1597_s4 + $0x38] sm:$0xff]  ;;  %1073 = vmatprep.subr.mxu0 %v602_v4  ;;  %v775_v3 = vld [vmem:[%s1599_s6 + $0x20] sm:$0xff] }
 0x117   :  { %526 = vmatprep.subr.mxu1 %v207_v6  ;;  %v601_v6 = vld [vmem:[%s1597_s4 + $0xb0] sm:$0xff]  ;;  %1074 = vmatpush3.msra.mxu0 %v586_v5  ;;  %v790_v4 = vld [vmem:[%s1599_s6 + $0x98] sm:$0xff] }
 0x118   :  { %527 = vmatpush1.msra.mxu1 %v206_v7  ;;  %v585_v7 = vld [vmem:[%s1597_s4 + $0x30] sm:$0xff]  ;;  %1075 = vmatprep.subr.mxu0 %v601_v6  ;;  %v774_v5 = vld [vmem:[%s1599_s6 + $0x18] sm:$0xff] }
 0x119   :  { %528 = vmatprep.subr.mxu1 %v201_v8  ;;  %v600_v8 = vld [vmem:[%s1597_s4 + $0xa8] sm:$0xff]  ;;  %1076 = vmatpush3.msra.mxu0 %v585_v7  ;;  %v789_v6 = vld [vmem:[%s1599_s6 + $0x90] sm:$0xff] }
 0x11a   :  { %529 = vmatpush1.msra.mxu1 %v200_v9  ;;  %v584_v9 = vld [vmem:[%s1597_s4 + $0x28] sm:$0xff]  ;;  %1077 = vmatprep.subr.mxu0 %v600_v8  ;;  %v773_v7 = vld [vmem:[%s1599_s6 + $0x10] sm:$0xff] }
 0x11b   :  { %530 = vmatprep.subr.mxu1 %v195_v10  ;;  %v599_v10 = vld [vmem:[%s1597_s4 + $0xa0] sm:$0xff]  ;;  %1078 = vmatpush3.msra.mxu0 %v584_v9  ;;  %v788_v8 = vld [vmem:[%s1599_s6 + $0x88] sm:$0xff] }
 0x11c   :  { %531 = vmatpush1.msra.mxu1 %v194_v11  ;;  %v583_v11 = vld [vmem:[%s1597_s4 + $0x20] sm:$0xff]  ;;  %1079 = vmatprep.subr.mxu0 %v599_v10  ;;  %v772_v9 = vld [vmem:[%s1599_s6 + $0x8] sm:$0xff] }
 0x11d   :  { %532 = vmatprep.subr.mxu1 %v189_v12  ;;  %v598_v12 = vld [vmem:[%s1597_s4 + $0x98] sm:$0xff]  ;;  %1080 = vmatpush3.msra.mxu0 %v583_v11  ;;  %v787_v10 = vld [vmem:[%s1599_s6 + $0x80] sm:$0xff] }
 0x11e   :  { %533 = vmatpush1.msra.mxu1 %v188_v13  ;;  %v582_v13 = vld [vmem:[%s1597_s4 + $0x18] sm:$0xff]  ;;  %1081 = vmatprep.subr.mxu0 %v598_v12  ;;  %v771_v11 = vld [vmem:[%s1599_s6] sm:$0xff] }
 0x11f   :  { %534 = vmatprep.subr.mxu1 %v183_v14  ;;  %1082 = vmatpush3.msra.mxu0 %v582_v13  ;;  %v597_v14 = vld [vmem:[%s1597_s4 + $0x90] sm:$0xff]  ;;  %v876_v12 = vld [vmem:[%s1600_s7 + $0x18] sm:$0xff] }
 0x120   :  { %535 = vmatpush1.msra.mxu1 %v182_v15  ;;  %1083 = vmatprep.subr.mxu0 %v597_v14  ;;  %v581_v15 = vld [vmem:[%s1597_s4 + $0x10] sm:$0xff] }
 0x121   :  { %536 = vmatprep.subr.mxu1 %v177_v16  ;;  %1084 = vmatpush3.msra.mxu0 %v581_v15  ;;  %v596_v16 = vld [vmem:[%s1597_s4 + $0x88] sm:$0xff] }
 0x122   :  { %537 = vmatpush1.msra.mxu1 %v176_v17  ;;  %1085 = vmatprep.subr.mxu0 %v596_v16  ;;  %v580_v17 = vld [vmem:[%s1597_s4 + $0x8] sm:$0xff] }
 0x123   :  { %538 = vmatprep.subr.mxu1 %v363_v18  ;;  %1086 = vmatpush3.msra.mxu0 %v580_v17  ;;  %v595_v18 = vld [vmem:[%s1597_s4 + $0x80] sm:$0xff]  ;;  %v875_v17 = vld [vmem:[%s1600_s7 + $0x10] sm:$0xff] }
 0x124   :  { %539 = vmatpush2.msra.mxu1 %v362_v19  ;;  %v579_v19 = vld [vmem:[%s1597_s4] sm:$0xff]  ;;  %1087 = vmatprep.subr.mxu0 %v595_v18  ;;  %v874_v18 = vld [vmem:[%s1600_s7 + $0x8] sm:$0xff] }
 0x125   :  { %540 = vmatprep.subr.mxu1 %v357_v20  ;;  %1088 = vmatpush3.msra.mxu0 %v579_v19  ;;  %v873_v19 = vld [vmem:[%s1600_s7] sm:$0xff] }
 0x126   :  { %541 = vmatpush2.msra.mxu1 %v356_v21 }
 0x127   :  { %542 = vmatprep.subr.mxu1 %v351_v22 }
 0x128   :  { %543 = vmatpush2.msra.mxu1 %v350_v23 }
 0x129   :  { %544 = vmatprep.subr.mxu1 %v345_v24 }
 0x12a   :  { %545 = vmatpush2.msra.mxu1 %v344_v25 }
 0x12b   :  { %546 = vmatprep.subr.mxu1 %v339_v26 }
 0x12c   :  { %547 = vmatpush2.msra.mxu1 %v338_v27 }
 0x12d   :  { %548 = vmatprep.subr.mxu1 %v333_v28 }
 0x12e   :  { %549 = vmatpush2.msra.mxu1 %v332_v29 }
 0x12f   :  { %550 = vmatprep.subr.mxu1 %v327_v30 }
 0x130   :  { %551 = vmatpush2.msra.mxu1 %v326_v31 }
 0x131   :  { %552 = vmatprep.subr.mxu1 %v321_v32 }
 0x132   :  { %553 = vmatpush2.msra.mxu1 %v320_v33 }
 0x133   :  { %554 = vmatprep.subr.mxu1 %v315_v34 }
 0x134   :  { %555 = vmatpush2.msra.mxu1 %v314_v35 }
 0x135   :  { %556 = vmatprep.subr.mxu1 %v309_v36 }
 0x136   :  { %557 = vmatpush2.msra.mxu1 %v308_v37  ;;  %v694_v37 = vld [vmem:[%s1598_s5 + $0x8] sm:$0xff] }
 0x137   :  { %558 = vmatprep.subr.mxu1 %v303_v38  ;;  %v693_v38 = vld [vmem:[%s1598_s5] sm:$0xff]  ;;  %728 = vmatprep.subr.mxu0 %v694_v37 }
 0x138   :  { %559 = vmatpush2.msra.mxu1 %v302_v39  ;;  %v802_v39 = vld [vmem:[%s1599_s6 + $0xf8] sm:$0xff] }
 0x139   :  { %560 = vmatprep.subr.mxu1 %v297_v40 }
 0x13a   :  { %561 = vmatpush2.msra.mxu1 %v296_v41 }
 0x13b   :  { %562 = vmatprep.subr.mxu1 %v291_v42 }
 0x13c   :  { %563 = vmatpush2.msra.mxu1 %v290_v43  ;;  %v786_v43 = vld [vmem:[%s1599_s6 + $0x78] sm:$0xff] }
 0x13d   :  { %564 = vmatprep.subr.mxu1 %v285_v44  ;;  %v801_v44 = vld [vmem:[%s1599_s6 + $0xf0] sm:$0xff] }
 0x13e   :  { %565 = vmatpush2.msra.mxu1 %v284_v45  ;;  %v785_v45 = vld [vmem:[%s1599_s6 + $0x70] sm:$0xff] }
 0x13f   :  { %566 = vmatprep.subr.mxu1 %v279_v46  ;;  %v800_v46 = vld [vmem:[%s1599_s6 + $0xe8] sm:$0xff] }
 0x140   :  { %567 = vmatpush2.msra.mxu1 %v278_v47  ;;  %v784_v47 = vld [vmem:[%s1599_s6 + $0x68] sm:$0xff] }
 0x141   :  { %568 = vmatprep.subr.mxu1 %v273_v48  ;;  %v799_v48 = vld [vmem:[%s1599_s6 + $0xe0] sm:$0xff] }
 0x142   :  { %569 = vmatpush2.msra.mxu1 %v272_v50  ;;  %v783_v50 = vld [vmem:[%s1599_s6 + $0x60] sm:$0xff] }
 0x143   :  { %571 = vmatmul.mubr.f32.vlgmr.msra.gmra.mxu1 %v1336_v49  ;;  %1137 = vmatprep.subr.mxu1 %v1220_v0 }
 0x144   :  { %1138 = vmatpush3.msra.mxu1 %v876_v12  ;;  %1145 = vmatprep.mubr.msk.f32.mxu1 %vm1221_vm2, %v1220_v0 }
 0x145   :  { %1139 = vmatprep.subr.mxu1 %v1220_v0 }
 0x146   :  { %1140 = vmatpush3.msra.mxu1 %v875_v17 }
 0x147   :  { %1141 = vmatprep.subr.mxu1 %v1220_v0 }
 0x148   :  { %1142 = vmatpush3.msra.mxu1 %v874_v18 }
 0x149   :  { %1143 = vmatprep.subr.mxu1 %v1220_v0 }
 0x14a   :  { %1144 = vmatpush3.msra.mxu1 %v873_v19 }
 0x14b   :  { %1148 = vmatprep.subr.mxu1 %v1220_v0 }
 0x1c3   :  { %v430_v20 = vpop.f32.mrf.mxu1  ;;  %v1439_v26 = vpop.f32.mrf.mxu0 }
 0x1c5   :  { %v432_v21 = vpop.f32.mrf.mxu1  ;;  %v1441_v27 = vpop.f32.mrf.mxu0 }
 0x203   :  { %v572_v22 = vpop.f32.mrf.mxu1 }
 0x204   :  { %v577_v25 = vmul.f32 %v572_v22, %v430_v20 }
 0x205   :  { %v574_v23 = vpop.f32.mrf.mxu1 }
 0x206   :  { %v578_v24 = vmul.f32 %v574_v23, %v432_v21  ;;  %v955_v23 = vld [vmem:[%s1601_s8 + $0x18] sm:$0xff] }
 0x208   :  { %675 = vmatprep.mubr.f32.mxu0 %v578_v24  ;;  %v954_v24 = vld [vmem:[%s1601_s8 + $0x10] sm:$0xff] }
 0x209   :  { %676 = vmatmul.mubr.f32.vlgmr.msra.gmra.mxu0 %v577_v25  ;;  %v953_v25 = vld [vmem:[%s1601_s8 + $0x8] sm:$0xff] }
 0x20a   :  { %762 = vmatprep.mubr.f32.mxu0 %v1220_v0  ;;  %729 = vmatpush1.msra.mxu0 %v693_v38 }
 0x20b   :  { %1092 = vmatprep.subr.mxu0 %v802_v39 }
 0x2c9   :  { %v1089_v28 = vpop.f32.mrf.mxu0 }
 0x2cb   :  { %v1090_v29 = vpop.f32.mrf.mxu0 }
 0x2cc   :  { %v1091_v30 = vadd.f32 %v1090_v29, %v1089_v28 }
 0x2ce   :  { %v682_v31 = vsel %vm681_vm1, %v1091_v30, -inf }
 0x2cf   :  { %683 = vmax.xlane.f32.xlu0 %v682_v31 }
 0x358   :  { %v684_v32 = vpop.xlane.xlu0 %683 }
 0x359   :  { %v685_v33 = vsub.f32 %v1091_v30, %v684_v32  ;;  %v1055_v30 = vld [vmem:[%s1602_s9] ss:$0 sm:$0xff] }
 0x35b   :  { %v686_v34 = vmul.f32 1.442695, %v685_v33 }
 0x35d   :  { %1169 = vpow2.f32 %v686_v34 }
 0x36a   :  { %v1170_v35 = vpop.eup %1169 }
 0x36b   :  { %v688_v36 = vsel %vm681_vm1, %v1170_v35, 0.0 }
 0x36c   :  { %689 = vadd.xlane.f32.xlu0 %v688_v36 }
 0x3f5   :  { %v690_v40 = vpop.xlane.xlu0 %689 }
 0x3f6   :  { %1171 = vrcp.f32 %v690_v40 }
 0x403   :  { %v1172_v41 = vpop.eup %1171 }
 0x404   :  { %v692_v42 = vmul.f32 %v1172_v41, %v1170_v35 }
 0x406   :  { %1053 = vmatmul.mubr.msk.f32.vlgmr.msra.gmra.mxu0 %vm681_vm1, %v692_v42 }
 0x407   :  { %1093 = vmatpush3.msra.mxu0 %v786_v43 }
 0x408   :  { %1094 = vmatprep.subr.mxu0 %v801_v44 }
 0x409   :  { %1095 = vmatpush3.msra.mxu0 %v785_v45 }
 0x40a   :  { %1096 = vmatprep.subr.mxu0 %v800_v46 }
 0x40b   :  { %1097 = vmatpush3.msra.mxu0 %v784_v47 }
 0x40c   :  { %1098 = vmatprep.subr.mxu0 %v799_v48 }
 0x40d   :  { %1099 = vmatpush3.msra.mxu0 %v783_v50 }
 0x40e   :  { %1100 = vmatprep.subr.mxu0 %v798_v51 }
 0x40f   :  { %1101 = vmatpush3.msra.mxu0 %v782_v52 }
 0x410   :  { %1102 = vmatprep.subr.mxu0 %v797_v53 }
 0x411   :  { %1103 = vmatpush3.msra.mxu0 %v781_v54 }
 0x412   :  { %1104 = vmatprep.subr.mxu0 %v796_v55 }
 0x413   :  { %1105 = vmatpush3.msra.mxu0 %v780_v56 }
 0x414   :  { %1106 = vmatprep.subr.mxu0 %v795_v57 }
 0x415   :  { %1107 = vmatpush3.msra.mxu0 %v779_v58 }
 0x416   :  { %1108 = vmatprep.subr.mxu0 %v794_v59 }
 0x417   :  { %1109 = vmatpush3.msra.mxu0 %v778_v60 }
 0x418   :  { %1110 = vmatprep.subr.mxu0 %v793_v61 }
 0x419   :  { %1111 = vmatpush3.msra.mxu0 %v777_v62 }
 0x41a   :  { %1112 = vmatprep.subr.mxu0 %v792_v63 }
 0x41b   :  { %1113 = vmatpush3.msra.mxu0 %v776_v1 }
 0x41c   :  { %1114 = vmatprep.subr.mxu0 %v791_v2 }
 0x41d   :  { %1115 = vmatpush3.msra.mxu0 %v775_v3 }
 0x41e   :  { %1116 = vmatprep.subr.mxu0 %v790_v4 }
 0x41f   :  { %1117 = vmatpush3.msra.mxu0 %v774_v5 }
 0x420   :  { %1118 = vmatprep.subr.mxu0 %v789_v6 }
 0x421   :  { %1119 = vmatpush3.msra.mxu0 %v773_v7 }
 0x422   :  { %1120 = vmatprep.subr.mxu0 %v788_v8 }
 0x423   :  { %1121 = vmatpush3.msra.mxu0 %v772_v9 }
 0x424   :  { %1122 = vmatprep.subr.mxu0 %v787_v10 }
 0x425   :  { %1123 = vmatpush3.msra.mxu0 %v771_v11 }
 0x4c6   :  { %v764_v13 = vpop.f32.mrf.mxu0 }
 0x4c7   :  { %v769_v16 = vmul.f32 %v764_v13, %v1439_v26  ;;  %v952_v26 = vld [vmem:[%s1601_s8] sm:$0xff]  ;;  %s1193_s8 = scalar_lea.vmem %s1044_s0, 128 }
 0x4c8   :  { %v766_v14 = vpop.f32.mrf.mxu0  ;;  %p1194_p5 = scmp.ne.s32.totalorder %s1044_s0, %s1193_s8  ;;  %p1199_p7 = scmp.lt.s32.totalorder %s1193_s8, %s1193_s8 }
 0x4c9   :  { %v770_v15 = vmul.f32 %v766_v14, %v1441_v27 }
 0x4ca   :  { %p1200_p8 = por %p1199_p7, %p1198_p6 }
 0x4cb   :  { %867 = vmatprep.mubr.f32.mxu0 %v770_v15 }
 0x4cc   :  { %868 = vmatmul.mubr.f32.vlgmr.msra.gmra.mxu0 %v769_v16  ;;  %p1201_p9 = pnand %p1200_p8, %p1194_p5 }
 0x58c   :  { %v1124_v20 = vpop.f32.mrf.mxu0 }
 0x58e   :  { %v1125_v21 = vpop.f32.mrf.mxu0 }
 0x58f   :  { %v1126_v22 = vadd.f32 %v1125_v21, %v1124_v20 }
 0x591   :  { %1146 = vmatmul.mubr.msk.f32.vlgmr.msra.gmra.mxu1 %vm877_vm3, %v1126_v22 }
 0x592   :  { %1149 = vmatpush3.msra.mxu1 %v955_v23  ;;  %1156 = vmatprep.mubr.msk.f32.mxu1 %vm1221_vm2, %v1220_v0 }
 0x593   :  { %1150 = vmatprep.subr.mxu1 %v1220_v0 }
 0x594   :  { %1151 = vmatpush3.msra.mxu1 %v954_v24 }
 0x595   :  { %1152 = vmatprep.subr.mxu1 %v1220_v0 }
 0x596   :  { %1153 = vmatpush3.msra.mxu1 %v953_v25 }
 0x597   :  { %1154 = vmatprep.subr.mxu1 %v1220_v0 }
 0x598   :  { %1155 = vmatpush3.msra.mxu1 %v952_v26 }
 0x651   :  { %v947_v27 = vpop.f32.mrf.mxu1 }
 0x652   :  { %v951_v28 = vadd.f32 %v947_v27, %v1336_v49 }
 0x653   :  { %v1147_v29 = vpop.f32.mrf.mxu1 }
 0x654   :  { %1157 = vmatmul.mubr.msk.f32.vlgmr.msra.gmra.mxu1 %vm877_vm3, %v951_v28 }
 0x714   :  { %v1032_v31 = vpop.f32.mrf.mxu1 }
 0x715   :  { %v1033_v32 = vadd.f32 %v1055_v30, %v1032_v31 }
 0x716   :  { %v1158_v0 = vpop.f32.mrf.mxu1 }
 0x717   :  { %1036 = vst.msk [vmem:[#allocation5] sm:$0xff] %vm681_vm1, %v1033_v32 }
 0x718   :  { %1204 = shalt.err (!%p1201_p9)
}
 0x719   :  { %1046 = dma.vmem_to_hbm [thread:$0]  %s1044_s0, 128, %s1603_s10, [#allocation4]  }
 0x71a   :  { %1215 = dma.done.wait [#allocation4], 128  }
 0x71b   :  { %1216 = vsyncadd [#allocation4], 4294967168 }
 0x71c   :  { %1050 = vsyncpa [#allocation3], 1 }
 0x71d   :  { %1051 = vsyncpa [#allocation4], 1 }

</bundles_post_ra>
